<compile_context>
chip_gen: v7x
topology: tpu7x:2x2x1
jax: 0.10.0
libtpu: 0.0.40
codegen_flags: <defaults>
</compile_context>

<pallas_src>
import jax
import jax.numpy as jnp
from jax.experimental import pallas as pl
from jax.experimental.pallas import tpu as pltpu

# fastvit_t8: head.in_features == 768
BMODEL_OUT_FEAT = 768
EXTRA_IN_FEAT = 31
OUT_FEAT = 20
LANE = 128  # TPU vreg lane width


def _head_kernel(feat_ref, extra_ref, w_ref, b_ref, o_ref, x_ref):
    """o = ([feat | extra] @ W_cat + b)[:, :out]   (W_cat pre-transposed, N zero-padded)."""
    f_dim = feat_ref.shape[1]
    o_dim = o_ref.shape[1]
    # Build the concatenated operand in VMEM scratch: x = [feat | extra].
    # feat occupies lanes [0, 768) (lane-aligned, dense stores); extra is the
    # 31-lane masked tail.
    x_ref[:, :f_dim] = feat_ref[...]
    x_ref[:, f_dim:] = extra_ref[...]
    # Single MXU matmul with f32 accumulation against the lane-padded weight.
    y = (
        jnp.dot(x_ref[...], w_ref[...], preferred_element_type=jnp.float32)
        + b_ref[...]
    )
    # Store only the real output columns (padding columns of W are zeros).
    o_ref[...] = y[:, :o_dim].astype(o_ref.dtype)


def make_kdrive_head(weight, bias):
    """Build the head callable.

    weight: (OUT_FEAT, BMODEL_OUT_FEAT + EXTRA_IN_FEAT)  torch nn.Linear layout
    bias:   (OUT_FEAT,)

    The weight transpose / zero-padding to a lane-dense N is done ONCE here
    (model-load time), not on every forward.
    """
    o_dim, in_dim = weight.shape
    n_pad = max(LANE, ((o_dim + LANE - 1) // LANE) * LANE)  # 20 -> 128

    w_cat = (
        jnp.zeros((in_dim, n_pad), jnp.float32)
        .at[:, :o_dim]
        .set(weight.T.astype(jnp.float32))
    )
    b_pad = (
        jnp.zeros((1, n_pad), jnp.float32)
        .at[:, :o_dim]
        .set(bias.astype(jnp.float32))
    )

    def head(feat, extra_inp):
        B, f_dim = feat.shape
        e_dim = extra_inp.shape[1]

        return pl.pallas_call(
            _head_kernel,
            out_shape=jax.ShapeDtypeStruct((B, o_dim), jnp.float32),
            in_specs=[
                pl.BlockSpec(memory_space=pltpu.MemorySpace.VMEM),  # feat
                pl.BlockSpec(memory_space=pltpu.MemorySpace.VMEM),  # extra
                pl.BlockSpec(memory_space=pltpu.MemorySpace.VMEM),  # W_cat
                pl.BlockSpec(memory_space=pltpu.MemorySpace.VMEM),  # bias
            ],
            out_specs=pl.BlockSpec(memory_space=pltpu.MemorySpace.VMEM),
            scratch_shapes=[pltpu.VMEM((B, f_dim + e_dim), jnp.float32)],
        )(feat, extra_inp, w_cat, b_pad)

    return jax.jit(head)


def _reference(feat, extra_inp, weight, bias):
    x = jnp.concatenate([feat, extra_inp], axis=1)
    return jnp.dot(x, weight.T, precision=jax.lax.Precision.HIGHEST) + bias


if __name__ == "__main__":
    key = jax.random.PRNGKey(0)
    k_feat, k_extra, k_w, k_b = jax.random.split(key, 4)

    B = 2
    # Backbone output features (stand-in for base_model(x); see TODO above).
    feat = jax.random.normal(k_feat, (B, BMODEL_OUT_FEAT), dtype=jnp.float32)
    extra_inp = jax.random.normal(k_extra, (B, EXTRA_IN_FEAT), dtype=jnp.float32)

    # Deterministic head parameters, torch.nn.Linear layout: (out, in).
    in_dim = BMODEL_OUT_FEAT + EXTRA_IN_FEAT
    bound = 1.0 / jnp.sqrt(in_dim)
    weight = jax.random.uniform(
        k_w, (OUT_FEAT, in_dim), minval=-bound, maxval=bound, dtype=jnp.float32
    )
    bias = jax.random.uniform(
        k_b, (OUT_FEAT,), minval=-bound, maxval=bound, dtype=jnp.float32
    )

    # Weight prep (transpose + pad) happens once, outside the per-call path.
    kdrive_head = make_kdrive_head(weight, bias)

    out = kdrive_head(feat, extra_inp)
    out = jax.block_until_ready(out)

    ref = _reference(feat, extra_inp, weight, bias)
    assert out.shape == (B, OUT_FEAT)
    assert jnp.allclose(out, ref, atol=1e-4, rtol=1e-4), "mismatch vs reference"

    print("KERNEL_OK")
</pallas_src>

<mosaic_0001>
module attributes {stable_mosaic.version = 11 : i64} {
  func.func @_head_kernel(%arg0: memref<2x768xf32, #tpu.memory_space<vmem>>, %arg1: memref<2x31xf32, #tpu.memory_space<vmem>>, %arg2: memref<799x128xf32, #tpu.memory_space<vmem>>, %arg3: memref<1x128xf32, #tpu.memory_space<vmem>>, %arg4: memref<2x20xf32, #tpu.memory_space<vmem>>, %arg5: memref<2x799xf32, #tpu.memory_space<vmem>>) attributes {dimension_semantics = [], scalar_prefetch = 0 : i64, scratch_operands = 1 : i64, tpu.core_type = #tpu.core_type<tc>} {
    %c0 = arith.constant 0 : index
    %c0_0 = arith.constant 0 : index
    %0 = vector.load %arg0[%c0, %c0_0] : memref<2x768xf32, #tpu.memory_space<vmem>>, vector<2x768xf32>
    %c0_1 = arith.constant 0 : index
    %c0_2 = arith.constant 0 : index
    %1 = vector.load %arg5[%c0_1, %c0_2] : memref<2x799xf32, #tpu.memory_space<vmem>>, vector<2x768xf32>
    tpu.vector_store %arg5[%c0_1, %c0_2], %0 {strides = array<i32>} : memref<2x799xf32, #tpu.memory_space<vmem>>, vector<2x768xf32>,
    %c0_3 = arith.constant 0 : index
    %c0_4 = arith.constant 0 : index
    %2 = vector.load %arg1[%c0_3, %c0_4] : memref<2x31xf32, #tpu.memory_space<vmem>>, vector<2x31xf32>
    %c0_5 = arith.constant 0 : index
    %c768 = arith.constant 768 : index
    %3 = vector.load %arg5[%c0_5, %c768] : memref<2x799xf32, #tpu.memory_space<vmem>>, vector<2x31xf32>
    tpu.vector_store %arg5[%c0_5, %c768], %2 {strides = array<i32>} : memref<2x799xf32, #tpu.memory_space<vmem>>, vector<2x31xf32>,
    %c0_6 = arith.constant 0 : index
    %c0_7 = arith.constant 0 : index
    %4 = vector.load %arg5[%c0_6, %c0_7] : memref<2x799xf32, #tpu.memory_space<vmem>>, vector<2x799xf32>
    %c0_8 = arith.constant 0 : index
    %c0_9 = arith.constant 0 : index
    %5 = vector.load %arg2[%c0_8, %c0_9] : memref<799x128xf32, #tpu.memory_space<vmem>>, vector<799x128xf32>
    %cst = arith.constant dense<0.000000e+00> : vector<2x128xf32>
    %6 = tpu.matmul %4, %5, %cst {dimension_numbers = #tpu.dot_dimension_numbers<[1], [0], [0], [1], [0, 0, 1, 1], [], []>} : vector<2x799xf32>, vector<799x128xf32>, vector<2x128xf32> -> vector<2x128xf32>
    %c0_10 = arith.constant 0 : index
    %c0_11 = arith.constant 0 : index
    %7 = vector.load %arg3[%c0_10, %c0_11] : memref<1x128xf32, #tpu.memory_space<vmem>>, vector<1x128xf32>
    %8 = vector.broadcast %7 : vector<1x128xf32> to vector<2x128xf32>
    %9 = arith.addf %6, %8 : vector<2x128xf32>
    %10 = vector.extract_strided_slice %9 {offsets = [0, 0], sizes = [2, 20], strides = [1, 1]} : vector<2x128xf32> to vector<2x20xf32>
    %c0_12 = arith.constant 0 : index
    %c0_13 = arith.constant 0 : index
    %11 = vector.load %arg4[%c0_12, %c0_13] : memref<2x20xf32, #tpu.memory_space<vmem>>, vector<2x20xf32>
    tpu.vector_store %arg4[%c0_12, %c0_13], %10 {strides = array<i32>} : memref<2x20xf32, #tpu.memory_space<vmem>>, vector<2x20xf32>,
    return
  }
}

</mosaic_0001>

<bundles_post_ra>
// kernel: head.1
= control target key start
LH: loop header
LB: loop body
LE: loop exit
PB: predicated region body
PF: predicated region fallthrough
CT: control target
= control target key end

     0   :  { %9 = vsyncpa [#allocation4], 0  ;;  %s908_s0 = inlined_call_operand.hbm [shape: f32[2,768], index: 0, kind: input, shape index: {}]   ;;  %s909_s1 = inlined_call_operand.vmem [shape: f32[2,31], index: 1, kind: input, shape index: {}]   ;;  %s910_s2 = inlined_call_operand.hbm [shape: f32[799,128], index: 2, kind: input, shape index: {}]   ;;  %s911_s3 = inlined_call_operand.vmem [shape: f32[1,128], index: 3, kind: input, shape index: {}]   ;;  %s912_s4 = inlined_call_operand.hbm [shape: f32[2,20], index: 4, kind: output, shape index: {}]  }
   0x1   :  { %10 = vsyncpa [#allocation7], 0 }
   0x2   :  { %11 = vsyncpa [#allocation5], 0  ;;  %s817_s15 = smov [#allocation3]   ;;  %s818_s17 = smov [#allocation6]  }
   0x3   :  { %s18_s16 = sshll.u32 %s817_s15, 4  ;;  %s29_s18 = sshll.u32 %s818_s17, 4  ;;  %s19_s16 = int_to_ptr.vmem [resolvable:$true] %s18_s16  ;;  %s852_s18 = int_to_ptr.vmem [resolvable:$true] %s29_s18 }
   0x4   :  { %s745_s21 = scalar_lea.hbm %s908_s0, 192 }
   0x5   :  { %p746_p0 = scmp.ne.s32.totalorder %s908_s0, %s745_s21  ;;  %p749_p1 = scmp.lt.u32.totalorder %s745_s21, %s908_s0 }
   0x7   :  { %p751_p2 = pnand %p749_p1, %p746_p0 }
   0x9   :  { %754 = shalt.err (!%p751_p2)
}
   0xa   :  { %s755_s26 = scalar_lea.vmem %s19_s16, 192  ;;  %p760_p4 = scmp.lt.s32.totalorder %s19_s16, %s19_s16 }
   0xb   :  { %p756_p3 = scmp.ne.s32.totalorder %s19_s16, %s755_s26  ;;  %p761_p5 = scmp.lt.s32.totalorder %s755_s26, %s755_s26 }
   0xd   :  { %p762_p6 = por %p761_p5, %p760_p4 }
   0xf   :  { %p763_p7 = pnand %p762_p6, %p756_p3 }
  0x11   :  { %766 = shalt.err (!%p763_p7)
}
  0x12   :  { %21 = dma.hbm_to_vmem [thread:$0]  %s908_s0, 192, %s19_s16, [#allocation4]  }
  0x13   :  { %s767_s5 = scalar_lea.hbm %s910_s2, 12800 }
  0x14   :  { %p768_p8 = scmp.ne.s32.totalorder %s910_s2, %s767_s5  ;;  %p771_p9 = scmp.lt.u32.totalorder %s767_s5, %s910_s2 }
  0x16   :  { %p773_p10 = pnand %p771_p9, %p768_p8 }
  0x18   :  { %776 = shalt.err (!%p773_p10)
}
  0x19   :  { %s777_s10 = scalar_lea.vmem %s852_s18, 12800  ;;  %p782_p12 = scmp.lt.s32.totalorder %s852_s18, %s852_s18 }
  0x1a   :  { %p778_p11 = scmp.ne.s32.totalorder %s852_s18, %s777_s10  ;;  %p783_p13 = scmp.lt.s32.totalorder %s777_s10, %s777_s10 }
  0x1c   :  { %p784_p0 = por %p783_p13, %p782_p12 }
  0x1e   :  { %p785_p1 = pnand %p784_p0, %p778_p11 }
  0x20   :  { %788 = shalt.err (!%p785_p1)
}
  0x21   :  { %s819_s0 = smov 128   ;;  %s820_s11 = smov 8  }
  0x22   :  { %35 = dma.hbm_to_vmem [thread:$0]  %s910_s2, 12800, %s852_s18, [#allocation7], %s819_s0, %s819_s0, %s820_s11  }
  0x23   :  { %811 = dma.done.wait [#allocation4], 192  }
  0x24   :  { %812 = vsyncadd [#allocation4], 4294967104 }
  0x25   :  { %813 = dma.done.wait [#allocation7], 12800  }
  0x26   :  { %814 = vsyncadd [#allocation7], 4294954496  ;;  %v69_v0 = vld [vmem:[#allocation6 + $0x80] sm:$0xff]  ;;  %v70_v1 = vld [vmem:[#allocation6 + $0x88] sm:$0xff]  ;;  %v821_v43 = vmov 1983009808   ;;  %v166_v45 = vlaneseq }
  0x27   :  { %v53_v2 = vld [vmem:[#allocation6] sm:$0xff]  ;;  %v630_v3 = vpack.c.bf16 %v70_v1, %v69_v0  ;;  %v54_v4 = vld [vmem:[#allocation6 + $0x8] sm:$0xff]  ;;  %v71_v11 = vld [vmem:[#allocation6 + $0x90] sm:$0xff]  ;;  %v164_v44 = vunpack.c.l.s4 %v821_v43  ;;  %vm49_vm0 = vcmask 246784   ;;  %vm204_vm1 = vcmask 1046528   ;;  %s826_s16 = smov [#allocation8]  }
  0x28   :  { %v101_v5 = vld [vmem:[#allocation6 + $0x180] sm:$0xff]  ;;  %v102_v6 = vld [vmem:[#allocation6 + $0x188] sm:$0xff]  ;;  %v632_v7 = vpack.c.bf16 %v54_v4, %v53_v2  ;;  %v72_v13 = vld [vmem:[#allocation6 + $0x98] sm:$0xff]  ;;  %v167_v60 = vshrl.u32 %v166_v45, 7  ;;  %vm823_vm2 = vmmov 1   ;;  %vm824_vm4 = vmmov 0  }
  0x29   :  { %v662_v8 = vpack.c.bf16 %v102_v6, %v101_v5  ;;  %v85_v9 = vld [vmem:[#allocation6 + $0x100] sm:$0xff]  ;;  %v86_v10 = vld [vmem:[#allocation6 + $0x108] sm:$0xff]  ;;  %631 = vmatprep.subr.bf16.mxu0 %v630_v3  ;;  %v55_v14 = vld [vmem:[#allocation6 + $0x10] sm:$0xff]  ;;  %v634_v16 = vpack.c.bf16 %v72_v13, %v71_v11  ;;  %v165_v59 = vunpack.c.0.s8 %v164_v44  ;;  %vm201_vm5 = vcmask 252928   ;;  %s496_s17 = sshll.u32 %s826_s16, 4  ;;  %s497_s17 = int_to_ptr.vmem [resolvable:$true] %s496_s17 }
  0x2a   :  { %v664_v12 = vpack.c.bf16 %v86_v10, %v85_v9  ;;  %v56_v15 = vld [vmem:[#allocation6 + $0x18] sm:$0xff]  ;;  %633 = vmatpush3.bf16.msra.mxu0 %v632_v7  ;;  %v103_v18 = vld [vmem:[#allocation6 + $0x190] sm:$0xff]  ;;  %v73_v23 = vld [vmem:[#allocation6 + $0xa0] sm:$0xff]  ;;  %vm488_vm6 = vcmask 156672   ;;  %p794_p3 = scmp.lt.s32.totalorder %s497_s17, %s497_s17 }
  0x2b   :  { %663 = vmatprep.subr.bf16.mxu1 %v662_v8  ;;  %v636_v17 = vpack.c.bf16 %v56_v15, %v55_v14  ;;  %v104_v19 = vld [vmem:[#allocation6 + $0x198] sm:$0xff]  ;;  %v87_v20 = vld [vmem:[#allocation6 + $0x110] sm:$0xff]  ;;  %v74_v24 = vld [vmem:[#allocation6 + $0xa8] sm:$0xff]  ;;  %635 = vmatprep.subr.bf16.mxu0 %v634_v16  ;;  %v883_v10 = vsub.s32 %v165_v59, %v167_v60 }
  0x2c   :  { %665 = vmatpush3.bf16.msra.mxu1 %v664_v12  ;;  %v666_v21 = vpack.c.bf16 %v104_v19, %v103_v18  ;;  %v88_v22 = vld [vmem:[#allocation6 + $0x118] sm:$0xff]  ;;  %v638_v26 = vpack.c.bf16 %v74_v24, %v73_v23  ;;  %v57_v27 = vld [vmem:[#allocation6 + $0x20] sm:$0xff]  ;;  %v58_v28 = vld [vmem:[#allocation6 + $0x28] sm:$0xff] }
  0x2d   :  { %v668_v25 = vpack.c.bf16 %v88_v22, %v87_v20  ;;  %v105_v29 = vld [vmem:[#allocation6 + $0x1a0] sm:$0xff]  ;;  %v106_v30 = vld [vmem:[#allocation6 + $0x1a8] sm:$0xff]  ;;  %v640_v33 = vpack.c.bf16 %v58_v28, %v57_v27  ;;  %v75_v35 = vld [vmem:[#allocation6 + $0xb0] sm:$0xff] }
  0x2e   :  { %667 = vmatprep.subr.bf16.mxu1 %v666_v21  ;;  %v89_v31 = vld [vmem:[#allocation6 + $0x120] sm:$0xff]  ;;  %v90_v32 = vld [vmem:[#allocation6 + $0x128] sm:$0xff]  ;;  %637 = vmatpush3.bf16.msra.mxu0 %v636_v17  ;;  %v670_v34 = vpack.c.bf16 %v106_v30, %v105_v29  ;;  %v76_v36 = vld [vmem:[#allocation6 + $0xb8] sm:$0xff] }
  0x2f   :  { %v59_v37 = vld [vmem:[#allocation6 + $0x30] sm:$0xff]  ;;  %639 = vmatprep.subr.bf16.mxu0 %v638_v26  ;;  %v672_v38 = vpack.c.bf16 %v90_v32, %v89_v31  ;;  %v642_v39 = vpack.c.bf16 %v76_v36, %v75_v35  ;;  %v60_v40 = vld [vmem:[#allocation6 + $0x38] sm:$0xff]  ;;  %v77_v49 = vld [vmem:[#allocation6 + $0xc0] sm:$0xff] }
  0x30   :  { %669 = vmatpush3.bf16.msra.mxu1 %v668_v25  ;;  %v107_v41 = vld [vmem:[#allocation6 + $0x1b0] sm:$0xff]  ;;  %v108_v42 = vld [vmem:[#allocation6 + $0x1b8] sm:$0xff]  ;;  %v78_v50 = vld [vmem:[#allocation6 + $0xc8] sm:$0xff]  ;;  %v644_v51 = vpack.c.bf16 %v60_v40, %v59_v37 }
  0x31   :  { %671 = vmatprep.subr.bf16.mxu1 %v670_v34  ;;  %v674_v46 = vpack.c.bf16 %v108_v42, %v107_v41  ;;  %v91_v47 = vld [vmem:[#allocation6 + $0x130] sm:$0xff]  ;;  %v92_v48 = vld [vmem:[#allocation6 + $0x138] sm:$0xff]  ;;  %v109_v52 = vld [vmem:[#allocation6 + $0x1c0] sm:$0xff]  ;;  %v646_v55 = vpack.c.bf16 %v78_v50, %v77_v49 }
  0x32   :  { %641 = vmatpush3.bf16.msra.mxu0 %v640_v33  ;;  %v110_v53 = vld [vmem:[#allocation6 + $0x1c8] sm:$0xff]  ;;  %v676_v54 = vpack.c.bf16 %v92_v48, %v91_v47  ;;  %v61_v56 = vld [vmem:[#allocation6 + $0x40] sm:$0xff]  ;;  %v79_v63 = vld [vmem:[#allocation6 + $0xd0] sm:$0xff] }
  0x33   :  { %643 = vmatprep.subr.bf16.mxu0 %v642_v39  ;;  %v62_v57 = vld [vmem:[#allocation6 + $0x48] sm:$0xff]  ;;  %v93_v58 = vld [vmem:[#allocation6 + $0x140] sm:$0xff]  ;;  %v678_v61 = vpack.c.bf16 %v110_v53, %v109_v52  ;;  %v80_v0 = vld [vmem:[#allocation6 + $0xd8] sm:$0xff] }
  0x34   :  { %673 = vmatpush3.bf16.msra.mxu1 %v672_v38  ;;  %v94_v62 = vld [vmem:[#allocation6 + $0x148] sm:$0xff]  ;;  %v111_v1 = vld [vmem:[#allocation6 + $0x1d0] sm:$0xff]  ;;  %v112_v2 = vld [vmem:[#allocation6 + $0x1d8] sm:$0xff]  ;;  %v648_v3 = vpack.c.bf16 %v62_v57, %v61_v56  ;;  %v650_v6 = vpack.c.bf16 %v80_v0, %v79_v63 }
  0x35   :  { %675 = vmatprep.subr.bf16.mxu1 %v674_v46  ;;  %v63_v4 = vld [vmem:[#allocation6 + $0x50] sm:$0xff]  ;;  %v680_v5 = vpack.c.bf16 %v94_v62, %v93_v58  ;;  %v64_v7 = vld [vmem:[#allocation6 + $0x58] sm:$0xff]  ;;  %v682_v11 = vpack.c.bf16 %v112_v2, %v111_v1  ;;  %v81_v12 = vld [vmem:[#allocation6 + $0xe0] sm:$0xff]  ;;  %v822_v62 = vmov 0.0|0.0  }
  0x36   :  { %645 = vmatpush3.bf16.msra.mxu0 %v644_v51  ;;  %v95_v8 = vld [vmem:[#allocation6 + $0x150] sm:$0xff]  ;;  %v96_v9 = vld [vmem:[#allocation6 + $0x158] sm:$0xff]  ;;  %v82_v13 = vld [vmem:[#allocation6 + $0xe8] sm:$0xff]  ;;  %v652_v16 = vpack.c.bf16 %v64_v7, %v63_v4 }
  0x37   :  { %647 = vmatprep.subr.bf16.mxu0 %v646_v55  ;;  %v113_v14 = vld [vmem:[#allocation6 + $0x1e0] sm:$0xff]  ;;  %v114_v15 = vld [vmem:[#allocation6 + $0x1e8] sm:$0xff]  ;;  %v684_v17 = vpack.c.bf16 %v96_v9, %v95_v8  ;;  %v44_v18 = vld [vmem:[#allocation3] sm:$0xff]  ;;  %v654_v19 = vpack.c.bf16 %v82_v13, %v81_v12  ;;  %v825_v8 = vmov 0.0  }
  0x38   :  { %677 = vmatpush3.bf16.msra.mxu1 %v676_v54  ;;  %v65_v20 = vld [vmem:[#allocation6 + $0x60] sm:$0xff]  ;;  %v66_v21 = vld [vmem:[#allocation6 + $0x68] sm:$0xff]  ;;  %v169_v23 = vrot.slane %v44_v18, %v883_v10  ;;  %v162_v24 = vcombine.high %v44_v18, %v44_v18  ;;  %v686_v25 = vpack.c.bf16 %v114_v15, %v113_v14  ;;  %v83_v27 = vld [vmem:[#allocation6 + $0xf0] sm:$0xff] }
  0x39   :  { %679 = vmatprep.subr.bf16.mxu1 %v678_v61  ;;  %v97_v22 = vld [vmem:[#allocation6 + $0x160] sm:$0xff]  ;;  %v98_v26 = vld [vmem:[#allocation6 + $0x168] sm:$0xff]  ;;  %v84_v28 = vld [vmem:[#allocation6 + $0xf8] sm:$0xff]  ;;  %v656_v33 = vpack.c.bf16 %v66_v21, %v65_v20 }
  0x3a   :  { %649 = vmatpush3.bf16.msra.mxu0 %v648_v3  ;;  %v115_v29 = vld [vmem:[#allocation6 + $0x1f0] sm:$0xff]  ;;  %v116_v30 = vld [vmem:[#allocation6 + $0x1f8] sm:$0xff]  ;;  %v177_v31 = vcombine.high %v169_v23, %v169_v23  ;;  %v176_v32 = vrot.slane %v162_v24, %v883_v10  ;;  %v688_v34 = vpack.c.bf16 %v98_v26, %v97_v22  ;;  %v658_v35 = vpack.c.bf16 %v84_v28, %v83_v27  ;;  %v133_v42 = vld [vmem:[#allocation6 + $0x280] sm:$0xff] }
  0x3b   :  { %651 = vmatprep.subr.bf16.mxu0 %v650_v6  ;;  %v67_v36 = vld [vmem:[#allocation6 + $0x70] sm:$0xff]  ;;  %v68_v37 = vld [vmem:[#allocation6 + $0x78] sm:$0xff]  ;;  %v690_v40 = vpack.c.bf16 %v116_v30, %v115_v29  ;;  %v134_v43 = vld [vmem:[#allocation6 + $0x288] sm:$0xff] }
  0x3c   :  { %681 = vmatpush3.bf16.msra.mxu1 %v680_v5  ;;  %v99_v38 = vld [vmem:[#allocation6 + $0x170] sm:$0xff]  ;;  %v178_v39 = vcombine.high %v176_v32, %v176_v32  ;;  %272 = vmatprep.mubr.f32.mxu0 %v177_v31  ;;  %v100_v41 = vld [vmem:[#allocation6 + $0x178] sm:$0xff]  ;;  %v660_v44 = vpack.c.bf16 %v68_v37, %v67_v36  ;;  %v694_v46 = vpack.c.bf16 %v134_v43, %v133_v42  ;;  %v117_v47 = vld [vmem:[#allocation6 + $0x200] sm:$0xff] }
  0x3d   :  { %683 = vmatprep.subr.bf16.mxu1 %v682_v11  ;;  %v692_v45 = vpack.c.bf16 %v100_v41, %v99_v38  ;;  %v118_v48 = vld [vmem:[#allocation6 + $0x208] sm:$0xff]  ;;  %v135_v49 = vld [vmem:[#allocation6 + $0x290] sm:$0xff]  ;;  %v136_v50 = vld [vmem:[#allocation6 + $0x298] sm:$0xff] }
  0x3e   :  { %653 = vmatpush3.bf16.msra.mxu0 %v652_v16  ;;  %342 = vmatprep.mubr.f32.mxu1 %v178_v39  ;;  %v119_v51 = vld [vmem:[#allocation6 + $0x210] sm:$0xff]  ;;  %v696_v52 = vpack.c.bf16 %v118_v48, %v117_v47  ;;  %v120_v53 = vld [vmem:[#allocation6 + $0x218] sm:$0xff]  ;;  %v149_v54 = vld [vmem:[#allocation6 + $0x300] sm:$0xff]  ;;  %v698_v56 = vpack.c.bf16 %v136_v50, %v135_v49 }
  0x3f   :  { %655 = vmatprep.subr.bf16.mxu0 %v654_v19  ;;  %v150_v55 = vld [vmem:[#allocation6 + $0x308] sm:$0xff]  ;;  %v137_v57 = vld [vmem:[#allocation6 + $0x2a0] sm:$0xff]  ;;  %v45_v59 = vld [vmem:[#allocation3 + $0x8] sm:$0xf]  ;;  %v700_v1 = vpack.c.bf16 %v120_v53, %v119_v51 }
  0x40   :  { %685 = vmatpush3.bf16.msra.mxu1 %v684_v17  ;;  %v727_v58 = vpack.c.bf16 %v150_v55, %v149_v54  ;;  %v48_v60 = vld [vmem:[%s909_s1] sm:$0x3]  ;;  %v138_v61 = vld [vmem:[#allocation6 + $0x2a8] sm:$0xff]  ;;  %47 = vst [vmem:[#allocation2 + $0x8] sm:$0xf] %v45_v59  ;;  %v151_v63 = vld [vmem:[#allocation6 + $0x310] sm:$0xff] }
  0x41   :  { %687 = vmatprep.subr.bf16.mxu1 %v686_v25  ;;  %50 = vst.msk [vmem:[#allocation2 + $0xc] sm:$0x3] %vm49_vm0, %v48_v60  ;;  %v152_v0 = vld [vmem:[#allocation6 + $0x318] sm:$0x7f]  ;;  %v702_v2 = vpack.c.bf16 %v138_v61, %v137_v57  ;;  %v121_v3 = vld [vmem:[#allocation6 + $0x220] sm:$0xff]  ;;  %v122_v4 = vld [vmem:[#allocation6 + $0x228] sm:$0xff] }
  0x42   :  { %657 = vmatpush3.bf16.msra.mxu0 %v656_v33  ;;  %v730_v5 = vpack.c.bf16 %v152_v0, %v151_v63  ;;  %v139_v6 = vld [vmem:[#allocation6 + $0x2b0] sm:$0xff]  ;;  %v140_v7 = vld [vmem:[#allocation6 + $0x2b8] sm:$0xff]  ;;  %vm731_vm3 = vmpackc.low %vm204_vm1, %vm823_vm2  ;;  %v704_v9 = vpack.c.bf16 %v122_v4, %v121_v3 }
  0x43   :  { %659 = vmatprep.subr.bf16.mxu0 %v658_v35  ;;  %v706_v11 = vpack.c.bf16 %v140_v7, %v139_v6  ;;  %v123_v12 = vld [vmem:[#allocation6 + $0x230] sm:$0xff]  ;;  %v124_v13 = vld [vmem:[#allocation6 + $0x238] sm:$0xff]  ;;  %v141_v15 = vld [vmem:[#allocation6 + $0x2c0] sm:$0xff] }
  0x44   :  { %689 = vmatpush3.bf16.msra.mxu1 %v688_v34  ;;  %v142_v16 = vld [vmem:[#allocation6 + $0x2c8] sm:$0xff]  ;;  %v708_v19 = vpack.c.bf16 %v124_v13, %v123_v12  ;;  %v143_v25 = vld [vmem:[#allocation6 + $0x2d0] sm:$0xff]  ;;  %v144_v26 = vld [vmem:[#allocation6 + $0x2d8] sm:$0xff] }
  0x45   :  { %691 = vmatprep.subr.bf16.mxu1 %v690_v40  ;;  %v710_v22 = vpack.c.bf16 %v142_v16, %v141_v15  ;;  %v126_v24 = vld [vmem:[#allocation6 + $0x248] sm:$0xff]  ;;  %v714_v28 = vpack.c.bf16 %v144_v26, %v143_v25  ;;  %v127_v29 = vld [vmem:[#allocation6 + $0x250] sm:$0xff]  ;;  %v128_v30 = vld [vmem:[#allocation6 + $0x258] sm:$0xff] }
  0x46   :  { %661 = vmatpush3.bf16.msra.mxu0 %v660_v44  ;;  %v145_v31 = vld [vmem:[#allocation6 + $0x2e0] sm:$0xff]  ;;  %v716_v33 = vpack.c.bf16 %v128_v30, %v127_v29  ;;  %v130_v35 = vld [vmem:[#allocation6 + $0x268] sm:$0xff]  ;;  %v147_v36 = vld [vmem:[#allocation6 + $0x2f0] sm:$0xff] }
  0x47   :  { %695 = vmatprep.subr.bf16.mxu0 %v694_v46  ;;  %v129_v34 = vld [vmem:[#allocation6 + $0x260] sm:$0xff]  ;;  %v148_v37 = vld [vmem:[#allocation6 + $0x2f8] sm:$0xff]  ;;  %v131_v40 = vld [vmem:[#allocation6 + $0x270] sm:$0xff] }
  0x48   :  { %693 = vmatpush3.bf16.msra.mxu1 %v692_v45  ;;  %v52_v14 = vld [vmem:[#allocation2 + $0x8] sm:$0x3f]  ;;  %v720_v38 = vpack.c.bf16 %v130_v35, %v129_v34  ;;  %v722_v39 = vpack.c.bf16 %v148_v37, %v147_v36  ;;  %v132_v41 = vld [vmem:[#allocation6 + $0x278] sm:$0xff]  ;;  %v506_v44 = vld [vmem:[%s911_s3] ss:$0 sm:$0xff]  ;;  %s789_s3 = scalar_lea.vmem %s497_s17, 32 }
  0x49   :  { %726 = vmatprep.subr.bf16.mxu1 %v822_v62  ;;  %273 = vmatmul.mubr.f32.vlgmr.msra.gmra.mrb[0].mxu0 %v169_v23  ;;  %v179_v17 = vcombine.high %v52_v14, %v52_v14  ;;  %v186_v18 = vrot.slane %v52_v14, %v883_v10  ;;  %v125_v23 = vld [vmem:[#allocation6 + $0x240] sm:$0xff]  ;;  %v724_v42 = vpack.c.bf16 %v132_v41, %v131_v40  ;;  %p790_p2 = scmp.ne.s32.totalorder %s497_s17, %s789_s3  ;;  %p795_p4 = scmp.lt.s32.totalorder %s789_s3, %s789_s3 }
  0x4a   :  { %697 = vmatpush3.bf16.msra.mxu0 %v696_v52  ;;  %v712_v27 = vpack.c.bf16 %v126_v24, %v125_v23 }
  0x4b   :  { %343 = vmatmul.mubr.f32.vlgmr.msra.gmra.mrb[0].mxu1 %v176_v32  ;;  %699 = vmatprep.subr.bf16.mxu0 %v698_v56  ;;  %v193_v20 = vrot.slane %v179_v17, %v883_v10  ;;  %v194_v21 = vcombine.high %v186_v18, %v186_v18  ;;  %v146_v32 = vld [vmem:[#allocation6 + $0x2e8] sm:$0xff]  ;;  %p796_p5 = por %p795_p4, %p794_p3 }
  0x4c   :  { %728 = vmatpush3.bf16.msra.mxu1 %v727_v58  ;;  %627 = vmatprep.mubr.msk.f32.mxu1 %vm824_vm4, %v825_v8  ;;  %v718_v10 = vpack.c.bf16 %v146_v32, %v145_v31 }
  0x4d   :  { %729 = vmatprep.subr.bf16.mxu1 %v822_v62  ;;  %412 = vmatprep.mubr.f32.mxu0 %v194_v21  ;;  %p797_p6 = pnand %p796_p5, %p790_p2 }
  0x4e   :  { %701 = vmatpush3.bf16.msra.mxu0 %v700_v1 }
  0x4f   :  { %703 = vmatprep.subr.bf16.mxu0 %v702_v2 }
  0x50   :  { %732 = vmatpush3.bf16.msk.msra.mxu1 %vm731_vm3, %v730_v5 }
  0x52   :  { %705 = vmatpush3.bf16.msra.mxu0 %v704_v9 }
  0x53   :  { %707 = vmatprep.subr.bf16.mxu0 %v706_v11  ;;  %628 = vmatmul.mubr.msk.f32.vlgmr.msra.gmra.mrb[2].mxu1 %vm201_vm5, %v193_v20 }
  0x56   :  { %709 = vmatpush3.bf16.msra.mxu0 %v708_v19 }
  0x57   :  { %711 = vmatprep.subr.bf16.mxu0 %v710_v22 }
  0x5a   :  { %713 = vmatpush3.bf16.msra.mxu0 %v712_v27 }
  0x5b   :  { %715 = vmatprep.subr.bf16.mxu0 %v714_v28 }
  0x5e   :  { %717 = vmatpush3.bf16.msra.mxu0 %v716_v33 }
  0x5f   :  { %719 = vmatprep.subr.bf16.mxu0 %v718_v10 }
  0x62   :  { %721 = vmatpush3.bf16.msra.mxu0 %v720_v38 }
  0x63   :  { %723 = vmatprep.subr.bf16.mxu0 %v722_v39 }
  0x66   :  { %725 = vmatpush3.bf16.msra.mxu0 %v724_v42 }
  0x69   :  { %413 = vmatmul.mubr.f32.vlgmr.msra.gmra.mrb[2].mxu0 %v186_v18 }
 0x11c   :  { %v541_v43 = vpop.f32.mrb[0].mxu0 }
 0x11d   :  { %v542_v45 = vpop.f32.mrb[1].mxu0 }
 0x11e   :  { %v576_v46 = vpop.f32.mrb[0].mxu1  ;;  %v543_v47 = vadd.f32 %v542_v45, %v541_v43 }
 0x11f   :  { %v577_v48 = vpop.f32.mrb[1].mxu1 }
 0x120   :  { %v578_v49 = vadd.f32 %v577_v48, %v576_v46  ;;  %v275_v50 = vadd.f32 %v543_v47, %v506_v44 }
 0x122   :  { %v345_v51 = vadd.f32 %v578_v49, %v275_v50 }
 0x126   :  { %v484_v52 = vpop.f32.mrb[2].mxu1 }
 0x127   :  { %v629_v53 = vpop.f32.mrb[3].mxu1 }
 0x13c   :  { %v611_v54 = vpop.f32.mrb[2].mxu0 }
 0x13d   :  { %v612_v55 = vpop.f32.mrb[3].mxu0 }
 0x13e   :  { %v613_v56 = vadd.f32 %v612_v55, %v611_v54 }
 0x140   :  { %v415_v57 = vadd.f32 %v613_v56, %v345_v51 }
 0x142   :  { %v485_v58 = vadd.f32 %v484_v52, %v415_v57 }
 0x144   :  { %489 = vst.msk [vmem:[#allocation8] sm:$0x3] %vm488_vm6, %v485_v58 }
 0x145   :  { %800 = shalt.err (!%p797_p6)
}
 0x146   :  { %s801_s20 = scalar_lea.hbm %s912_s4, 32 }
 0x147   :  { %p802_p7 = scmp.ne.s32.totalorder %s912_s4, %s801_s20  ;;  %p805_p8 = scmp.lt.u32.totalorder %s801_s20, %s912_s4 }
 0x149   :  { %p807_p9 = pnand %p805_p8, %p802_p7 }
 0x14b   :  { %810 = shalt.err (!%p807_p9)
}
 0x14c   :  { %499 = dma.vmem_to_hbm [thread:$0]  %s497_s17, 32, %s912_s4, [#allocation5]  }
 0x14d   :  { %815 = dma.done.wait [#allocation5], 32  }
 0x14e   :  { %816 = vsyncadd [#allocation5], 4294967264 }
 0x14f   :  { %503 = vsyncpa [#allocation4], 1 }
 0x150   :  { %504 = vsyncpa [#allocation7], 1 }
 0x151   :  { %505 = vsyncpa [#allocation5], 1 }

</bundles_post_ra>
